<compile_context>
chip_gen: v5e
topology: v5e:2x2
jax: 0.10.0
libtpu: 0.0.40
codegen_flags: <defaults>
</compile_context>

<pallas_src>
import functools

import jax
import jax.numpy as jnp
from jax import lax
from jax.experimental import pallas as pl
from jax.experimental.pallas import tpu as pltpu

FLOAT_MIN = float(jnp.finfo(jnp.float32).min)


def _round_up(x, m):
    return (x + m - 1) // m * m


def _select_node_kernel(
    x_ref,      # (TB, S)    f32            row-major state slab (nodes on sublanes)
    sm_ref,     # (2, TB)    f32            row 0 = spill weights, row 1 = action mask
    w1_ref,     # (FC1, S)   compute_dtype
    w2h_ref,    # (FC2, FC1) compute_dtype  fc2 weight minus its spill column
    w3_ref,     # (FC3, FC2) compute_dtype
    aux_ref,    # (U, 6)     f32            cols: b1 | w2_spill | b2 | b3 | w4 | b4(row0)
    out_ref,    # (2, TB)    f32            row 0 = masked logits, row 1 = pre-mask feats
    *, compute_dtype, fc1, fc2, fc3, chunk,
):
    # Constant operands: their block index never changes across the grid, so
    # Pallas DMAs them once; load them once per step and reuse across chunks.
    w1 = w1_ref[...]
    w2h = w2h_ref[...]
    w3 = w3_ref[...]
    b1 = aux_ref[0:fc1, 0:1]
    w2s = aux_ref[0:fc2, 1:2]
    b2 = aux_ref[0:fc2, 2:3]
    b3 = aux_ref[0:fc3, 3:4]
    w4 = aux_ref[0:fc3, 4:5]
    b4 = aux_ref[0:1, 5:6]

    tb = x_ref.shape[0]
    # Contract the feature axis of both operands: W (out,in) x X (nodes,in)
    # -> (out, nodes).  The implied RHS transpose is absorbed in-kernel, so
    # the state never needs a host-side HBM transpose.
    dn = (((1,), (1,)), ((), ()))

    # Static sub-chunking of the lane slab: offsets are Python ints, so every
    # slice is a zero-cost ref view (no dynamic lane-dim indexing) and the
    # per-chunk intermediates stay small instead of scaling with the block.
    for c in range(tb // chunk):
        lo = c * chunk
        x = x_ref[lo:lo + chunk, :].astype(compute_dtype)     # (chunk, S)
        spill = sm_ref[0:1, lo:lo + chunk]                    # (1, chunk) f32
        mask = sm_ref[1:2, lo:lo + chunk]                     # (1, chunk) f32

        # fc1 + relu   (feature-major: h = W @ x^T + b, chunk lanes wide)
        h1 = lax.dot_general(w1, x, dn,
                             preferred_element_type=jnp.float32) + b1
        h1 = jnp.maximum(h1, 0.0)

        # fc2 over cat([spill, h1]) + relu:
        # W2 @ cat([s; h]) == W2[:, :1] * s + W2[:, 1:] @ h  (exact split).
        h2 = (jnp.dot(w2h, h1.astype(compute_dtype),
                      preferred_element_type=jnp.float32)
              + w2s * spill + b2)
        h2 = jnp.maximum(h2, 0.0)

        # fc3 + relu
        h3 = jnp.dot(w3, h2.astype(compute_dtype),
                     preferred_element_type=jnp.float32) + b3
        h3 = jnp.maximum(h3, 0.0)

        # fc4 (one scalar per node): VPU multiply + sublane (XLU) reduce
        # instead of an N=1 MXU matmul; stays a lane-dense (1, chunk) row.
        logit = jnp.sum(h3 * w4, axis=0, keepdims=True) + b4

        # inf_mask = clamp(log(mask), min=FLOAT_MIN); log(0) -> FLOAT_MIN.
        inf_mask = jnp.maximum(jnp.log(mask), FLOAT_MIN)
        out_ref[0:1, lo:lo + chunk] = logit + inf_mask        # masked logits
        out_ref[1:2, lo:lo + chunk] = logit                   # self._features


def select_node_forward(state, spill_weights, action_mask, params, *,
                        block_lanes=1024, chunk_lanes=256,
                        matmul_dtype=jnp.bfloat16):
    """state: (B, N, S); spill_weights, action_mask: (B, N).

    Returns (masked_logits (B, N), features (B, N), input_state_list (B, N, S)).

    The state is consumed row-major straight from HBM (no wrapper transpose or
    cast pass); rows are only zero-padded up to a multiple of the per-step lane
    slab when M = B*N is misaligned.  Padded rows carry zero state / zero mask,
    so log(0) is clamped to FLOAT_MIN and the rows are sliced away.

    `block_lanes` = nodes per grid step, `chunk_lanes` = in-kernel sub-tile;
    both multiples of 128.  Per-step VMEM is a few hundred KiB, far below the
    limit on every generation (incl. v7x's 64 MiB).  bf16 is applied to MXU
    inputs only (supported on v5e/v6e/v7x); element-wise math stays f32 (v5e
    has no bf16 VPU/EUP).  Use matmul_dtype=jnp.float32 for an exact-f32 path.
    """
    assert chunk_lanes % 128 == 0 and block_lanes % chunk_lanes == 0
    B, N, S = state.shape
    M = B * N
    tc = chunk_lanes

    # Minimal padded row count, then pick the per-step slab.  If the step
    # count would be odd (>1), try re-splitting into one more, smaller step so
    # v7x's two TensorCores get equal halves -- but only when that does not
    # increase the total padding (no extra HBM traffic on v5e/v6e).
    m_base = _round_up(M, tc)
    tb = min(block_lanes, m_base)
    steps = -(-m_base // tb)
    m_pad = steps * tb
    if steps > 1 and steps % 2 == 1:
        steps2 = steps + 1
        tb2 = _round_up(-(-m_base // steps2), tc)
        if steps2 * tb2 <= m_pad:
            steps, tb, m_pad = steps2, tb2, steps2 * tb2
    pad = m_pad - M

    # Row-major f32 state (cast to matmul_dtype happens in-kernel on the VPU,
    # which is cheaper than an extra host-side HBM cast pass).
    x = state.reshape(M, S).astype(jnp.float32)
    sm = jnp.stack([spill_weights.reshape(M), action_mask.reshape(M)],
                   axis=0).astype(jnp.float32)                       # (2, M)
    if pad:
        x = jnp.pad(x, ((0, pad), (0, 0)))
        sm = jnp.pad(sm, ((0, 0), (0, pad)))

    (w1, b1), (w2, b2), (w3, b3), (w4, b4) = (
        params["fc1"], params["fc2"], params["fc3"], params["fc4"])
    fc1_u, fc2_u, fc3_u = w1.shape[0], w2.shape[0], w3.shape[0]

    # PyTorch Linear weights are (out, in); feature-major compute uses exactly
    # that orientation, so no weight transposes.  fc2's spill column is split
    # out of the matmul; it plus every bias plus w4/b4 are packed into one
    # small (U, 6) f32 aux operand (6 kernel inputs total instead of 10).
    w1_c = w1.astype(matmul_dtype)                                   # (fc1, S)
    w2h_c = w2[:, 1:].astype(matmul_dtype)                           # (fc2, fc1)
    w3_c = w3.astype(matmul_dtype)                                   # (fc3, fc2)
    u = max(fc1_u, fc2_u, fc3_u)
    aux = jnp.zeros((u, 6), jnp.float32)
    aux = aux.at[:fc1_u, 0].set(b1.astype(jnp.float32))
    aux = aux.at[:fc2_u, 1].set(w2[:, 0].astype(jnp.float32))
    aux = aux.at[:fc2_u, 2].set(b2.astype(jnp.float32))
    aux = aux.at[:fc3_u, 3].set(b3.astype(jnp.float32))
    aux = aux.at[:fc3_u, 4].set(w4.reshape(-1).astype(jnp.float32))
    aux = aux.at[0, 5].set(b4.reshape(()).astype(jnp.float32))

    full_spec = lambda a: pl.BlockSpec(a.shape, lambda i: (0, 0))    # resident

    out = pl.pallas_call(
        functools.partial(_select_node_kernel, compute_dtype=matmul_dtype,
                          fc1=fc1_u, fc2=fc2_u, fc3=fc3_u, chunk=tc),
        out_shape=jax.ShapeDtypeStruct((2, m_pad), jnp.float32),
        grid_spec=pltpu.PrefetchScalarGridSpec(
            num_scalar_prefetch=0,
            grid=(steps,),
            in_specs=[
                pl.BlockSpec((tb, S), lambda i: (i, 0)),   # state, row-major
                pl.BlockSpec((2, tb), lambda i: (0, i)),   # spill + mask
                full_spec(w1_c), full_spec(w2h_c), full_spec(w3_c),
                full_spec(aux),
            ],
            out_specs=pl.BlockSpec((2, tb), lambda i: (0, i)),  # lane-dense
        ),
        compiler_params=pltpu.CompilerParams(
            dimension_semantics=("parallel",)),
    )(x, sm, w1_c, w2h_c, w3_c, aux)

    masked_logits = out[0, :M].reshape(B, N)
    features = out[1, :M].reshape(B, N)
    # forward returns (x, state, input_state_list); the RNN state is empty here.
    return masked_logits, features, state


def init_params(key, state_size, fc1_units, fc2_units, fc3_units):
    """Deterministic PyTorch-Linear-style init (uniform +-1/sqrt(fan_in))."""
    def linear(key, out_f, in_f):
        kw, kb = jax.random.split(key)
        bound = 1.0 / jnp.sqrt(in_f)
        w = jax.random.uniform(kw, (out_f, in_f), jnp.float32, -bound, bound)
        b = jax.random.uniform(kb, (out_f,), jnp.float32, -bound, bound)
        return w, b

    k1, k2, k3, k4 = jax.random.split(key, 4)
    return {
        "fc1": linear(k1, fc1_units, state_size),
        "fc2": linear(k2, fc2_units, fc1_units + 1),
        "fc3": linear(k3, fc3_units, fc2_units),
        "fc4": linear(k4, 1, fc3_units),
    }
    # TODO(synk): GGNN (GCN) submodule is constructed in __init__ but never
    # used in forward(); value_function() / SlimFC value branch is also
    # outside forward() and is not implemented here.


def _reference_forward(state, spill_weights, action_mask, params):
    """Plain-JAX reference mirroring the PyTorch forward, for verification."""
    (w1, b1), (w2, b2), (w3, b3), (w4, b4) = (
        params["fc1"], params["fc2"], params["fc3"], params["fc4"])
    x = jax.nn.relu(state @ w1.T + b1)
    x = jnp.concatenate([spill_weights[..., None], x], axis=2)
    x = jax.nn.relu(x @ w2.T + b2)
    x = jax.nn.relu(x @ w3.T + b3)
    x = (x @ w4.T + b4)[..., 0]
    inf_mask = jnp.maximum(jnp.log(action_mask), FLOAT_MIN)
    return x + inf_mask, x


if __name__ == "__main__":
    # custom_model_config: state_size=32, fc1=32, fc2=32, fc3=32, max_nodes=8
    B, N, S = 2, 8, 32
    FC1, FC2, FC3 = 32, 32, 32

    key = jax.random.PRNGKey(0)
    kp, ks, kw, km = jax.random.split(key, 4)

    params = init_params(kp, S, FC1, FC2, FC3)
    state = jax.random.normal(ks, (B, N, S), jnp.float32)
    spill_weights = jax.random.uniform(kw, (B, N), jnp.float32)
    action_mask = (jax.random.uniform(km, (B, N)) > 0.3).astype(jnp.float32)

    ref_logits, ref_feats = _reference_forward(
        state, spill_weights, action_mask, params)

    # 1) f32 matmuls: tight correctness check against the plain-JAX reference.
    logits, features, state_out = select_node_forward(
        state, spill_weights, action_mask, params, matmul_dtype=jnp.float32)
    jax.block_until_ready((logits, features, state_out))
    assert logits.shape == (B, N) and features.shape == (B, N)
    assert jnp.allclose(features, ref_feats, atol=1e-3, rtol=1e-3)
    assert jnp.allclose(logits, ref_logits, atol=1e-3, rtol=1e-3)

    # 2) bf16 matmul inputs (production default): looser tolerance.
    logits_bf, features_bf, _ = select_node_forward(
        state, spill_weights, action_mask, params)
    jax.block_until_ready((logits_bf, features_bf))
    assert jnp.allclose(features_bf, ref_feats, atol=0.15, rtol=0.1)
    assert jnp.allclose(logits_bf, ref_logits, atol=0.15, rtol=0.1)

    # 3) padded rows + multi-chunk inner loop (M = 200 -> padded to 256,
    #    one grid step of 256 lanes split into 2 in-kernel chunks of 128).
    B2, N2 = 4, 50
    k1, k2, k3 = jax.random.split(jax.random.PRNGKey(1), 3)
    state2 = jax.random.normal(k1, (B2, N2, S), jnp.float32)
    spill2 = jax.random.uniform(k2, (B2, N2), jnp.float32)
    mask2 = (jax.random.uniform(k3, (B2, N2)) > 0.3).astype(jnp.float32)
    logits2, feats2, _ = select_node_forward(
        state2, spill2, mask2, params,
        block_lanes=256, chunk_lanes=128, matmul_dtype=jnp.float32)
    jax.block_until_ready((logits2, feats2))
    ref_logits2, ref_feats2 = _reference_forward(state2, spill2, mask2, params)
    assert jnp.allclose(feats2, ref_feats2, atol=1e-3, rtol=1e-3)
    assert jnp.allclose(logits2, ref_logits2, atol=1e-3, rtol=1e-3)

    # 4) multi-grid-step path with even-step rebalancing (M = 2560 -> 4 steps
    #    of 768 lanes, 3 in-kernel chunks of 256 each), default tile sizes.
    B3, N3 = 8, 320
    k4, k5, k6 = jax.random.split(jax.random.PRNGKey(2), 3)
    state3 = jax.random.normal(k4, (B3, N3, S), jnp.float32)
    spill3 = jax.random.uniform(k5, (B3, N3), jnp.float32)
    mask3 = (jax.random.uniform(k6, (B3, N3)) > 0.3).astype(jnp.float32)
    logits3, feats3, _ = select_node_forward(
        state3, spill3, mask3, params, matmul_dtype=jnp.float32)
    jax.block_until_ready((logits3, feats3))
    ref_logits3, ref_feats3 = _reference_forward(state3, spill3, mask3, params)
    assert jnp.allclose(feats3, ref_feats3, atol=2e-3, rtol=2e-3)
    assert jnp.allclose(logits3, ref_logits3, atol=2e-3, rtol=2e-3)

    print("KERNEL_OK")
</pallas_src>

<mosaic_0001>
module attributes {stable_mosaic.version = 11 : i64} {
  func.func @_select_node_kernel(%arg0: i32, %arg1: memref<256x32xf32, #tpu.memory_space<vmem>>, %arg2: memref<2x256xf32, #tpu.memory_space<vmem>>, %arg3: memref<32x32xf32, #tpu.memory_space<vmem>>, %arg4: memref<32x32xf32, #tpu.memory_space<vmem>>, %arg5: memref<32x32xf32, #tpu.memory_space<vmem>>, %arg6: memref<32x6xf32, #tpu.memory_space<vmem>>, %arg7: memref<2x256xf32, #tpu.memory_space<vmem>>) attributes {dimension_semantics = [#tpu.dimension_semantics<parallel>], iteration_bounds = array<i64: 1>, scalar_prefetch = 0 : i64, scratch_operands = 0 : i64, tpu.core_type = #tpu.core_type<tc>, window_params = [{transform_indices = @transform_0, window_bounds = array<i64: 256, 32>}, {transform_indices = @transform_1, window_bounds = array<i64: 2, 256>}, {pipeline_mode = #tpu.pipeline_mode<synchronous>, transform_indices = @transform_2, window_bounds = array<i64: 32, 32>}, {pipeline_mode = #tpu.pipeline_mode<synchronous>, transform_indices = @transform_3, window_bounds = array<i64: 32, 32>}, {pipeline_mode = #tpu.pipeline_mode<synchronous>, transform_indices = @transform_4, window_bounds = array<i64: 32, 32>}, {pipeline_mode = #tpu.pipeline_mode<synchronous>, transform_indices = @transform_5, window_bounds = array<i64: 32, 6>}, {transform_indices = @transform_6, window_bounds = array<i64: 2, 256>}]} {
    %c0 = arith.constant 0 : index
    %c0_0 = arith.constant 0 : index
    %0 = vector.load %arg3[%c0, %c0_0] : memref<32x32xf32, #tpu.memory_space<vmem>>, vector<32x32xf32>
    %c0_1 = arith.constant 0 : index
    %c0_2 = arith.constant 0 : index
    %1 = vector.load %arg4[%c0_1, %c0_2] : memref<32x32xf32, #tpu.memory_space<vmem>>, vector<32x32xf32>
    %c0_3 = arith.constant 0 : index
    %c0_4 = arith.constant 0 : index
    %2 = vector.load %arg5[%c0_3, %c0_4] : memref<32x32xf32, #tpu.memory_space<vmem>>, vector<32x32xf32>
    %c0_5 = arith.constant 0 : index
    %c0_6 = arith.constant 0 : index
    %3 = vector.load %arg6[%c0_5, %c0_6] : memref<32x6xf32, #tpu.memory_space<vmem>>, vector<32x1xf32>
    %c0_7 = arith.constant 0 : index
    %c1 = arith.constant 1 : index
    %4 = vector.load %arg6[%c0_7, %c1] : memref<32x6xf32, #tpu.memory_space<vmem>>, vector<32x1xf32>
    %c0_8 = arith.constant 0 : index
    %c2 = arith.constant 2 : index
    %5 = vector.load %arg6[%c0_8, %c2] : memref<32x6xf32, #tpu.memory_space<vmem>>, vector<32x1xf32>
    %c0_9 = arith.constant 0 : index
    %c3 = arith.constant 3 : index
    %6 = vector.load %arg6[%c0_9, %c3] : memref<32x6xf32, #tpu.memory_space<vmem>>, vector<32x1xf32>
    %c0_10 = arith.constant 0 : index
    %c4 = arith.constant 4 : index
    %7 = vector.load %arg6[%c0_10, %c4] : memref<32x6xf32, #tpu.memory_space<vmem>>, vector<32x1xf32>
    %c0_11 = arith.constant 0 : index
    %c5 = arith.constant 5 : index
    %8 = vector.load %arg6[%c0_11, %c5] : memref<32x6xf32, #tpu.memory_space<vmem>>, vector<1x1xf32>
    %c0_12 = arith.constant 0 : index
    %c0_13 = arith.constant 0 : index
    %9 = vector.load %arg1[%c0_12, %c0_13] : memref<256x32xf32, #tpu.memory_space<vmem>>, vector<256x32xf32>
    %c0_14 = arith.constant 0 : index
    %c0_15 = arith.constant 0 : index
    %10 = vector.load %arg2[%c0_14, %c0_15] : memref<2x256xf32, #tpu.memory_space<vmem>>, vector<1x256xf32>
    %c1_16 = arith.constant 1 : index
    %c0_17 = arith.constant 0 : index
    %11 = vector.load %arg2[%c1_16, %c0_17] : memref<2x256xf32, #tpu.memory_space<vmem>>, vector<1x256xf32>
    %cst = arith.constant dense<0.000000e+00> : vector<32x256xf32>
    %12 = tpu.matmul %0, %9, %cst {dimension_numbers = #tpu.dot_dimension_numbers<[1], [1], [0], [0], [0, 0, 1, 0], [], []>} : vector<32x32xf32>, vector<256x32xf32>, vector<32x256xf32> -> vector<32x256xf32>
    %13 = vector.broadcast %3 : vector<32x1xf32> to vector<32x256xf32>
    %14 = arith.addf %12, %13 : vector<32x256xf32>
    %cst_18 = arith.constant 0.000000e+00 : f32
    %15 = vector.broadcast %cst_18 : f32 to vector<32x256xf32>
    %16 = arith.maximumf %14, %15 : vector<32x256xf32>
    %cst_19 = arith.constant dense<0.000000e+00> : vector<32x256xf32>
    %17 = tpu.matmul %1, %16, %cst_19 {dimension_numbers = #tpu.dot_dimension_numbers<[1], [0], [0], [1], [0, 0, 1, 1], [], []>} : vector<32x32xf32>, vector<32x256xf32>, vector<32x256xf32> -> vector<32x256xf32>
    %18 = vector.broadcast %4 : vector<32x1xf32> to vector<32x256xf32>
    %19 = vector.broadcast %10 : vector<1x256xf32> to vector<32x256xf32>
    %20 = arith.mulf %18, %19 : vector<32x256xf32>
    %21 = arith.addf %17, %20 : vector<32x256xf32>
    %22 = vector.broadcast %5 : vector<32x1xf32> to vector<32x256xf32>
    %23 = arith.addf %21, %22 : vector<32x256xf32>
    %cst_20 = arith.constant 0.000000e+00 : f32
    %24 = vector.broadcast %cst_20 : f32 to vector<32x256xf32>
    %25 = arith.maximumf %23, %24 : vector<32x256xf32>
    %cst_21 = arith.constant dense<0.000000e+00> : vector<32x256xf32>
    %26 = tpu.matmul %2, %25, %cst_21 {dimension_numbers = #tpu.dot_dimension_numbers<[1], [0], [0], [1], [0, 0, 1, 1], [], []>} : vector<32x32xf32>, vector<32x256xf32>, vector<32x256xf32> -> vector<32x256xf32>
    %27 = vector.broadcast %6 : vector<32x1xf32> to vector<32x256xf32>
    %28 = arith.addf %26, %27 : vector<32x256xf32>
    %cst_22 = arith.constant 0.000000e+00 : f32
    %29 = vector.broadcast %cst_22 : f32 to vector<32x256xf32>
    %30 = arith.maximumf %28, %29 : vector<32x256xf32>
    %31 = vector.broadcast %7 : vector<32x1xf32> to vector<32x256xf32>
    %32 = arith.mulf %30, %31 : vector<32x256xf32>
    %cst_23 = arith.constant dense<0.000000e+00> : vector<256xf32>
    %33 = vector.multi_reduction <add>, %32, %cst_23 [0] : vector<32x256xf32> to vector<256xf32>
    %34 = vector.shape_cast %33 : vector<256xf32> to vector<1x256xf32>
    %35 = vector.broadcast %8 : vector<1x1xf32> to vector<1x256xf32>
    %36 = arith.addf %34, %35 : vector<1x256xf32>
    %37 = math.log %11 : vector<1x256xf32>
    %cst_24 = arith.constant -3.40282347E+38 : f32
    %38 = vector.broadcast %cst_24 : f32 to vector<1x256xf32>
    %39 = arith.maximumf %37, %38 : vector<1x256xf32>
    %40 = arith.addf %36, %39 : vector<1x256xf32>
    %c0_25 = arith.constant 0 : index
    %c0_26 = arith.constant 0 : index
    %41 = vector.load %arg7[%c0_25, %c0_26] : memref<2x256xf32, #tpu.memory_space<vmem>>, vector<1x256xf32>
    tpu.vector_store %arg7[%c0_25, %c0_26], %40 {strides = array<i32>} : memref<2x256xf32, #tpu.memory_space<vmem>>, vector<1x256xf32>,
    %c1_27 = arith.constant 1 : index
    %c0_28 = arith.constant 0 : index
    %42 = vector.load %arg7[%c1_27, %c0_28] : memref<2x256xf32, #tpu.memory_space<vmem>>, vector<1x256xf32>
    tpu.vector_store %arg7[%c1_27, %c0_28], %36 {strides = array<i32>} : memref<2x256xf32, #tpu.memory_space<vmem>>, vector<1x256xf32>,
    return
  }
  func.func @transform_0(%arg0: i32) -> (i32, i32) {
    %c0_i32 = arith.constant 0 : i32
    %c0_i32_0 = arith.constant 0 : i32
    return %arg0, %c0_i32 : i32, i32
  }
  func.func @transform_1(%arg0: i32) -> (i32, i32) {
    %c0_i32 = arith.constant 0 : i32
    %c0_i32_0 = arith.constant 0 : i32
    return %c0_i32, %arg0 : i32, i32
  }
  func.func @transform_2(%arg0: i32) -> (i32, i32) {
    %c0_i32 = arith.constant 0 : i32
    %c0_i32_0 = arith.constant 0 : i32
    %c0_i32_1 = arith.constant 0 : i32
    return %c0_i32, %c0_i32_0 : i32, i32
  }
  func.func @transform_3(%arg0: i32) -> (i32, i32) {
    %c0_i32 = arith.constant 0 : i32
    %c0_i32_0 = arith.constant 0 : i32
    %c0_i32_1 = arith.constant 0 : i32
    return %c0_i32, %c0_i32_0 : i32, i32
  }
  func.func @transform_4(%arg0: i32) -> (i32, i32) {
    %c0_i32 = arith.constant 0 : i32
    %c0_i32_0 = arith.constant 0 : i32
    %c0_i32_1 = arith.constant 0 : i32
    return %c0_i32, %c0_i32_0 : i32, i32
  }
  func.func @transform_5(%arg0: i32) -> (i32, i32) {
    %c0_i32 = arith.constant 0 : i32
    %c0_i32_0 = arith.constant 0 : i32
    %c0_i32_1 = arith.constant 0 : i32
    return %c0_i32, %c0_i32_0 : i32, i32
  }
  func.func @transform_6(%arg0: i32) -> (i32, i32) {
    %c0_i32 = arith.constant 0 : i32
    %c0_i32_0 = arith.constant 0 : i32
    return %c0_i32, %arg0 : i32, i32
  }
}

</mosaic_0001>

<bundles_post_ra>
// kernel: tpu_custom_call.1
= control target key start
LH: loop header
LB: loop body
LE: loop exit
PB: predicated region body
PF: predicated region fallthrough
CT: control target
= control target key end

     0   :  { %vm96_vm0 = vcmask 261120   ;;  %s977_s0 = inlined_call_operand.vmem [shape: f32[256,32], index: 0, kind: input, shape index: {}]   ;;  %s978_s1 = inlined_call_operand.vmem [shape: f32[2,256], index: 1, kind: input, shape index: {}]   ;;  %s979_s2 = inlined_call_operand.vmem [shape: f32[32,32], index: 2, kind: input, shape index: {}]   ;;  %s980_s3 = inlined_call_operand.vmem [shape: f32[32,32], index: 3, kind: input, shape index: {}]   ;;  %s981_s4 = inlined_call_operand.vmem [shape: f32[32,32], index: 4, kind: input, shape index: {}]   ;;  %s982_s5 = inlined_call_operand.vmem [shape: f32[32,6], index: 5, kind: input, shape index: {}]   ;;  %s983_s6 = inlined_call_operand.hbm [shape: f32[2,256], index: 6, kind: output, shape index: {}]  }
   0x1   :  { %v56_v0 = vld [vmem:[%s977_s0 + $0x78] sm:$0xff]  ;;  %v55_v2 = vld [vmem:[%s977_s0 + $0x70] sm:$0xff]  ;;  %v54_v4 = vld [vmem:[%s977_s0 + $0x68] sm:$0xff] }
   0x2   :  { %v72_v1 = vld [vmem:[%s977_s0 + $0xf8] sm:$0xff]  ;;  %590 = vmatpush.xpose.msk.msra.mxu0 %vm96_vm0, %v56_v0  ;;  %v71_v3 = vld [vmem:[%s977_s0 + $0xf0] sm:$0xff]  ;;  %v70_v5 = vld [vmem:[%s977_s0 + $0xe8] sm:$0xff] }
   0x3   :  { %610 = vmatpush.xpose.msk.msra.mxu1 %vm96_vm0, %v72_v1 }
   0x6   :  { %591 = vmatpush.xpose.msk.msra.mxu0 %vm96_vm0, %v55_v2 }
   0x7   :  { %611 = vmatpush.xpose.msk.msra.mxu1 %vm96_vm0, %v71_v3 }
   0x8   :  { %11 = vsyncpa [#allocation3], 0  ;;  %v53_v6 = vld [vmem:[%s977_s0 + $0x60] sm:$0xff]  ;;  %v52_v8 = vld [vmem:[%s977_s0 + $0x58] sm:$0xff]  ;;  %v695_v21 = vmov 0   ;;  %v696_v46 = vmov 1  }
   0x9   :  { %v69_v7 = vld [vmem:[%s977_s0 + $0xe0] sm:$0xff]  ;;  %v68_v9 = vld [vmem:[%s977_s0 + $0xd8] sm:$0xff]  ;;  %v51_v10 = vld [vmem:[%s977_s0 + $0x50] sm:$0xff]  ;;  %654 = vset.pattern.permute.xlu1 %v695_v21  ;;  %653 = vset.pattern.permute.xlu0 %v695_v21  ;;  %v697_v50 = vmov 2   ;;  %vm558_vm1 = vcmask 1040384  }
   0xa   :  { %592 = vmatpush.xpose.msk.msra.mxu0 %vm96_vm0, %v54_v4  ;;  %v67_v11 = vld [vmem:[%s977_s0 + $0xd0] sm:$0xff]  ;;  %v50_v12 = vld [vmem:[%s977_s0 + $0x48] sm:$0xff]  ;;  %v49_v14 = vld [vmem:[%s977_s0 + $0x40] sm:$0xff]  ;;  %655 = vset.pattern.permute.xlu2 %v696_v46 }
   0xb   :  { %612 = vmatpush.xpose.msk.msra.mxu1 %vm96_vm0, %v70_v5  ;;  %v66_v13 = vld [vmem:[%s977_s0 + $0xc8] sm:$0xff]  ;;  %v65_v15 = vld [vmem:[%s977_s0 + $0xc0] sm:$0xff]  ;;  %v48_v16 = vld [vmem:[%s977_s0 + $0x38] sm:$0xff] }
   0xc   :  { %v64_v17 = vld [vmem:[%s977_s0 + $0xb8] sm:$0xff]  ;;  %v810_v18 = vld [vmem:[%s982_s5 + $0x8] sm:$0xff]  ;;  %v47_v19 = vld [vmem:[%s977_s0 + $0x30] sm:$0xff] }
   0xd   :  { %v63_v20 = vld [vmem:[%s977_s0 + $0xb0] sm:$0xff]  ;;  %83 = vperm.xlu1 %654, %v810_v18   ;;  %v46_v22 = vld [vmem:[%s977_s0 + $0x28] sm:$0xff]  ;;  %v832_v24 = vld [vmem:[%s982_s5] sm:$0xff] }
   0xe   :  { %593 = vmatpush.xpose.msk.msra.mxu0 %vm96_vm0, %v53_v6  ;;  %v62_v23 = vld [vmem:[%s977_s0 + $0xa8] sm:$0xff]  ;;  %v45_v25 = vld [vmem:[%s977_s0 + $0x20] sm:$0xff]  ;;  %v44_v27 = vld [vmem:[%s977_s0 + $0x18] sm:$0xff] }
   0xf   :  { %613 = vmatpush.xpose.msk.msra.mxu1 %vm96_vm0, %v69_v7  ;;  %v61_v26 = vld [vmem:[%s977_s0 + $0xa0] sm:$0xff]  ;;  %v60_v28 = vld [vmem:[%s977_s0 + $0x98] sm:$0xff]  ;;  %v43_v30 = vld [vmem:[%s977_s0 + $0x10] sm:$0xff] }
  0x10   :  { %v854_v29 = vld [vmem:[%s982_s5 + $0x18] sm:$0xff]  ;;  %v59_v31 = vld [vmem:[%s977_s0 + $0x90] sm:$0xff]  ;;  %v42_v32 = vld [vmem:[%s977_s0 + $0x8] sm:$0xff] }
  0x11   :  { %93 = vperm.xlu0 %653, %v854_v29   ;;  %v58_v33 = vld [vmem:[%s977_s0 + $0x88] sm:$0xff]  ;;  %v876_v34 = vld [vmem:[%s982_s5 + $0x10] sm:$0xff]  ;;  %v41_v35 = vld [vmem:[%s977_s0] sm:$0xff]  ;;  %284 = vperm.xlu2 %655, %v854_v29  }
  0x12   :  { %594 = vmatpush.xpose.msk.msra.mxu0 %vm96_vm0, %v52_v8  ;;  %v57_v36 = vld [vmem:[%s977_s0 + $0x80] sm:$0xff]  ;;  %v25_v38 = vld [vmem:[%s979_s2 + $0x8] sm:$0xff]  ;;  %v26_v39 = vld [vmem:[%s979_s2 + $0x10] sm:$0xff]  ;;  %s580_s0 = sshll.u32 %s983_s6, 4  ;;  %s581_s0 = int_to_ptr.hbm [resolvable:$true] %s580_s0 }
  0x13   :  { %614 = vmatpush.xpose.msk.msra.mxu1 %vm96_vm0, %v68_v9  ;;  %v24_v37 = vld [vmem:[%s979_s2] sm:$0xff]  ;;  %v27_v40 = vld [vmem:[%s979_s2 + $0x18] sm:$0xff]  ;;  %v29_v8 = vld [vmem:[%s980_s3 + $0x8] sm:$0xff] }
  0x14   :  { %v28_v7 = vld [vmem:[%s980_s3] sm:$0xff]  ;;  %v30_v9 = vld [vmem:[%s980_s3 + $0x10] sm:$0xff] }
  0x15   :  { %78 = vperm.xlu1 %654, %v832_v24  }
  0x16   :  { %595 = vmatpush.xpose.msk.msra.mxu0 %vm96_vm0, %v51_v10  ;;  %v31_v10 = vld [vmem:[%s980_s3 + $0x18] sm:$0xff] }
  0x17   :  { %615 = vmatpush.xpose.msk.msra.mxu1 %vm96_vm0, %v67_v11 }
  0x19   :  { %88 = vperm.xlu0 %653, %v876_v34   ;;  %280 = vperm.xlu2 %655, %v876_v34  }
  0x1a   :  { %596 = vmatpush.xpose.msk.msra.mxu0 %vm96_vm0, %v50_v12 }
  0x1b   :  { %616 = vmatpush.xpose.msk.msra.mxu1 %vm96_vm0, %v66_v13 }
  0x1d   :  { %657 = vset.pattern.permute.xlu1 %v697_v50 }
  0x1e   :  { %597 = vmatpush.xpose.msk.msra.mxu0 %vm96_vm0, %v49_v14  ;;  %383 = vperm.xlu1 %657, %v854_v29  }
  0x1f   :  { %617 = vmatpush.xpose.msk.msra.mxu1 %vm96_vm0, %v65_v15 }
  0x21   :  { %656 = vset.pattern.permute.xlu0 %v696_v46  ;;  %272 = vperm.xlu2 %655, %v832_v24  }
  0x22   :  { %598 = vmatpush.xpose.msk.msra.mxu0 %vm96_vm0, %v48_v16  ;;  %276 = vperm.xlu0 %656, %v810_v18  }
  0x23   :  { %618 = vmatpush.xpose.msk.msra.mxu1 %vm96_vm0, %v64_v17 }
  0x26   :  { %599 = vmatpush.xpose.msk.msra.mxu0 %vm96_vm0, %v47_v19  ;;  %379 = vperm.xlu1 %657, %v876_v34   ;;  %v73_v19 = vld [vmem:[%s978_s1] ss:$2 sm:$0x3] }
  0x27   :  { %619 = vmatpush.xpose.msk.msra.mxu1 %vm96_vm0, %v63_v20 }
  0x29   :  { %658 = vset.pattern.permute.xlu2 %v697_v50 }
  0x2a   :  { %600 = vmatpush.xpose.msk.msra.mxu0 %vm96_vm0, %v46_v22  ;;  %659 = vset.pattern.permute.xlu0 %v697_v50  ;;  %v698_v22 = vmov 3  }
  0x2b   :  { %620 = vmatpush.xpose.msk.msra.mxu1 %vm96_vm0, %v62_v23  ;;  %371 = vperm.xlu0 %659, %v832_v24   ;;  %v288_v23 = vperm.slane %v73_v19, 0 }
  0x2c   :  { %375 = vperm.xlu2 %658, %v810_v18  }
  0x2e   :  { %601 = vmatpush.xpose.msk.msra.mxu0 %vm96_vm0, %v45_v25  ;;  %660 = vset.pattern.permute.xlu1 %v698_v22  ;;  %v289_v25 = vperm.slane %v73_v19, 1 }
  0x2f   :  { %621 = vmatpush.xpose.msk.msra.mxu1 %vm96_vm0, %v61_v26  ;;  %403 = vperm.xlu1 %660, %v832_v24  }
  0x32   :  { %602 = vmatpush.xpose.msk.msra.mxu0 %vm96_vm0, %v44_v27 }
  0x33   :  { %622 = vmatpush.xpose.msk.msra.mxu1 %vm96_vm0, %v60_v28 }
  0x34   :  { %661 = vset.pattern.permute.xlu2 %v698_v22 }
  0x35   :  { %407 = vperm.xlu2 %661, %v810_v18  }
  0x36   :  { %603 = vmatpush.xpose.msk.msra.mxu0 %vm96_vm0, %v43_v30 }
  0x37   :  { %623 = vmatpush.xpose.msk.msra.mxu1 %vm96_vm0, %v59_v31  ;;  %411 = vperm.xlu1 %660, %v876_v34  }
  0x3a   :  { %604 = vmatpush.xpose.msk.msra.mxu0 %vm96_vm0, %v42_v32 }
  0x3b   :  { %624 = vmatpush.xpose.msk.msra.mxu1 %vm96_vm0, %v58_v33 }
  0x3d   :  { %415 = vperm.xlu2 %661, %v854_v29  }
  0x3e   :  { %605 = vmatpush.xpose.msk.msra.mxu0 %vm96_vm0, %v41_v35 }
  0x3f   :  { %625 = vmatpush.xpose.msk.msra.mxu1 %vm96_vm0, %v57_v36 }
  0x41   :  { %606 = vmatmul.msk.f32.vlgmr.msra.gmra.mxu0 %vm96_vm0, %v24_v37 }
  0x42   :  { %626 = vmatmul.msk.f32.vlgmr.msra.gmra.mxu1 %vm96_vm0, %v24_v37 }
  0x49   :  { %607 = vmatmul.msk.f32.gmra.mxu0 %vm96_vm0, %v25_v38 }
  0x4a   :  { %627 = vmatmul.msk.f32.gmra.mxu1 %vm96_vm0, %v25_v38 }
  0x51   :  { %608 = vmatmul.msk.f32.gmra.mxu0 %vm96_vm0, %v26_v39 }
  0x52   :  { %628 = vmatmul.msk.f32.gmra.mxu1 %vm96_vm0, %v26_v39 }
  0x59   :  { %609 = vmatmul.msk.f32.gmra.mxu0 %vm96_vm0, %v27_v40 }
  0x5a   :  { %629 = vmatmul.msk.f32.gmra.mxu1 %vm96_vm0, %v27_v40 }
  0x6b   :  { %v285_v11 = vpop.permute.xlu2 %284 }
  0x6c   :  { %v298_v37 = vmul.f32 %v288_v23, %v285_v11  ;;  %v299_v38 = vmul.f32 %v289_v25, %v285_v11 }
  0x73   :  { %v281_v14 = vpop.permute.xlu2 %280 }
  0x74   :  { %v296_v28 = vmul.f32 %v288_v23, %v281_v14  ;;  %v297_v31 = vmul.f32 %v289_v25, %v281_v14 }
  0x7b   :  { %v273_v27 = vpop.permute.xlu2 %272 }
  0x7c   :  { %v292_v33 = vmul.f32 %v288_v23, %v273_v27  ;;  %v293_v35 = vmul.f32 %v289_v25, %v273_v27 }
  0x7f   :  { %v84_v47 = vpop.permute.xlu1 %83 }
  0x83   :  { %v94_v45 = vpop.permute.xlu0 %93 }
  0x87   :  { %v79_v58 = vpop.permute.xlu1 %78 }
  0x8b   :  { %v89_v51 = vpop.permute.xlu0 %88 }
  0x90   :  { %v384_v17 = vpop.permute.xlu1 %383 }
  0x94   :  { %v277_v26 = vpop.permute.xlu0 %276 }
  0x95   :  { %v294_v30 = vmul.f32 %v288_v23, %v277_v26  ;;  %v295_v32 = vmul.f32 %v289_v25, %v277_v26 }
  0x98   :  { %v380_v40 = vpop.permute.xlu1 %379 }
  0xbe   :  { %v222_v41 = vpop.f32.mrf.mxu0 }
  0xbf   :  { %v251_v42 = vpop.f32.mrf.mxu1  ;;  %v223_v63 = vadd.f32 %v222_v41, %v79_v58 }
  0xc0   :  { %v252_v0 = vadd.f32 %v251_v42, %v79_v58 }
  0xc1   :  { %v263_v5 = vmax.f32 %v223_v63, 0.0 }
  0xc2   :  { %v264_v6 = vmax.f32 %v252_v0, 0.0 }
  0xc6   :  { %v225_v43 = vpop.f32.mrf.mxu0 }
  0xc7   :  { %v254_v44 = vpop.f32.mrf.mxu1  ;;  %v226_v59 = vadd.f32 %v225_v43, %v84_v47 }
  0xc8   :  { %v255_v60 = vadd.f32 %v254_v44, %v84_v47 }
  0xc9   :  { %v265_v3 = vmax.f32 %v226_v59, 0.0 }
  0xca   :  { %v266_v4 = vmax.f32 %v255_v60, 0.0 }
  0xce   :  { %v228_v48 = vpop.f32.mrf.mxu0 }
  0xcf   :  { %v257_v49 = vpop.f32.mrf.mxu1  ;;  %v229_v54 = vadd.f32 %v228_v48, %v89_v51 }
  0xd0   :  { %v258_v55 = vadd.f32 %v257_v49, %v89_v51  ;;  %v376_v49 = vpop.permute.xlu2 %375  ;;  %v699_v51 = vmov 4  }
  0xd1   :  { %v267_v1 = vmax.f32 %v229_v54, 0.0  ;;  %662 = vset.pattern.permute.xlu0 %v699_v51  ;;  %663 = vset.pattern.permute.xlu1 %v699_v51 }
  0xd2   :  { %v268_v2 = vmax.f32 %v258_v55, 0.0  ;;  %497 = vperm.xlu0 %662, %v832_v24   ;;  %v372_v55 = vpop.permute.xlu0 %371  ;;  %501 = vperm.xlu1 %663, %v810_v18   ;;  %v40_v18 = vld [vmem:[%s982_s5] sm:$0x1] }
  0xd3   :  { %664 = vset.pattern.permute.xlu2 %v699_v51 }
  0xd4   :  { %505 = vperm.xlu2 %664, %v876_v34   ;;  %v34_v34 = vld [vmem:[%s981_s4 + $0x10] sm:$0xff] }
  0xd6   :  { %v231_v52 = vpop.f32.mrf.mxu0 }
  0xd7   :  { %v260_v53 = vpop.f32.mrf.mxu1  ;;  %v232_v56 = vadd.f32 %v231_v52, %v94_v45 }
  0xd8   :  { %v261_v57 = vadd.f32 %v260_v53, %v94_v45 }
  0xd9   :  { %v269_v61 = vmax.f32 %v232_v56, 0.0 }
  0xda   :  { %v270_v62 = vmax.f32 %v261_v57, 0.0  ;;  %509 = vperm.xlu1 %663, %v854_v29   ;;  %v35_v29 = vld [vmem:[%s981_s4 + $0x18] sm:$0xff] }
  0xdb   :  { %324 = vmatpush.msra.mxu2 %v269_v61 }
  0xdc   :  { %353 = vmatpush.msra.mxu3 %v270_v62 }
  0xdd   :  { %325 = vmatpush.msra.mxu2 %v267_v1 }
  0xde   :  { %354 = vmatpush.msra.mxu3 %v268_v2 }
  0xdf   :  { %326 = vmatpush.msra.mxu2 %v265_v3  ;;  %v32_v3 = vld [vmem:[%s981_s4] sm:$0xff] }
  0xe0   :  { %355 = vmatpush.msra.mxu3 %v266_v4  ;;  %v700_v4 = vmov 5  }
  0xe1   :  { %327 = vmatpush.msra.mxu2 %v263_v5  ;;  %666 = vset.pattern.permute.xlu0 %v700_v4  ;;  %v33_v5 = vld [vmem:[%s981_s4 + $0x8] sm:$0xff] }
  0xe2   :  { %356 = vmatpush.msra.mxu3 %v264_v6  ;;  %630 = vmatmul.msk.f32.vlgmr.msra.gmra.mxu2 %vm96_vm0, %v28_v7  ;;  %v404_v6 = vpop.permute.xlu1 %403 }
  0xe3   :  { %634 = vmatmul.msk.f32.vlgmr.msra.gmra.mxu3 %vm96_vm0, %v28_v7  ;;  %665 = vset.pattern.permute.xlu2 %v700_v4 }
  0xe4   :  { %540 = vperm.xlu2 %665, %v40_v18  }
  0xea   :  { %631 = vmatmul.msk.f32.gmra.mxu2 %vm96_vm0, %v29_v8 }
  0xeb   :  { %635 = vmatmul.msk.f32.gmra.mxu3 %vm96_vm0, %v29_v8 }
  0xf2   :  { %632 = vmatmul.msk.f32.gmra.mxu2 %vm96_vm0, %v30_v9 }
  0xf3   :  { %636 = vmatmul.msk.f32.gmra.mxu3 %vm96_vm0, %v30_v9  ;;  %v408_v9 = vpop.permute.xlu2 %407 }
  0xfa   :  { %633 = vmatmul.msk.f32.gmra.mxu2 %vm96_vm0, %v31_v10 }
  0xfb   :  { %637 = vmatmul.msk.f32.gmra.mxu3 %vm96_vm0, %v31_v10  ;;  %v412_v10 = vpop.permute.xlu1 %411 }
 0x144   :  { %v502_v23 = vpop.permute.xlu1 %501 }
 0x165   :  { %v329_v12 = vpop.f32.mrf.mxu2 }
 0x166   :  { %v358_v13 = vpop.f32.mrf.mxu3  ;;  %v330_v47 = vadd.f32 %v329_v12, %v292_v33 }
 0x167   :  { %v359_v48 = vadd.f32 %v358_v13, %v293_v35  ;;  %v416_v13 = vpop.permute.xlu2 %415 }
 0x168   :  { %v386_v60 = vadd.f32 %v372_v55, %v330_v47 }
 0x169   :  { %v387_v61 = vadd.f32 %v372_v55, %v359_v48 }
 0x16a   :  { %v394_v24 = vmax.f32 %v386_v60, 0.0 }
 0x16b   :  { %v395_v2 = vmax.f32 %v387_v61, 0.0 }
 0x16d   :  { %v332_v15 = vpop.f32.mrf.mxu2 }
 0x16e   :  { %v361_v16 = vpop.f32.mrf.mxu3  ;;  %v333_v41 = vadd.f32 %v332_v15, %v294_v30 }
 0x16f   :  { %v362_v44 = vadd.f32 %v361_v16, %v295_v32  ;;  %v498_v32 = vpop.permute.xlu0 %497  ;;  %v506_v33 = vpop.permute.xlu2 %505 }
 0x170   :  { %v388_v56 = vadd.f32 %v376_v49, %v333_v41 }
 0x171   :  { %v389_v57 = vadd.f32 %v376_v49, %v362_v44 }
 0x172   :  { %v396_v0 = vmax.f32 %v388_v56, 0.0 }
 0x173   :  { %v397_v1 = vmax.f32 %v389_v57, 0.0 }
 0x175   :  { %v335_v20 = vpop.f32.mrf.mxu2 }
 0x176   :  { %v364_v21 = vpop.f32.mrf.mxu3  ;;  %v336_v36 = vadd.f32 %v335_v20, %v296_v28 }
 0x177   :  { %v365_v39 = vadd.f32 %v364_v21, %v297_v31 }
 0x178   :  { %v390_v50 = vadd.f32 %v380_v40, %v336_v36 }
 0x179   :  { %v391_v52 = vadd.f32 %v380_v40, %v365_v39 }
 0x17a   :  { %v398_v62 = vmax.f32 %v390_v50, 0.0  ;;  %v510_v50 = vpop.permute.xlu1 %509 }
 0x17b   :  { %v399_v63 = vmax.f32 %v391_v52, 0.0 }
 0x17d   :  { %v338_v42 = vpop.f32.mrf.mxu2 }
 0x17e   :  { %v367_v43 = vpop.f32.mrf.mxu3  ;;  %v339_v45 = vadd.f32 %v338_v42, %v298_v37  ;;  %v589_v37 = vld [vmem:[%s978_s1 + $0x1] ss:$2 sm:$0x3]  ;;  %s701_s1 = smov [#allocation2]  }
 0x17f   :  { %v368_v46 = vadd.f32 %v367_v43, %v299_v38  ;;  %667 = vlog2.f32 %v589_v37  ;;  %s578_s22 = sshll.u32 %s701_s1, 4  ;;  %s579_s22 = int_to_ptr.vmem [resolvable:$true] %s578_s22 }
 0x180   :  { %v392_v53 = vadd.f32 %v384_v17, %v339_v45 }
 0x181   :  { %v393_v54 = vadd.f32 %v384_v17, %v368_v46 }
 0x182   :  { %v400_v58 = vmax.f32 %v392_v53, 0.0 }
 0x183   :  { %v401_v59 = vmax.f32 %v393_v54, 0.0 }
 0x184   :  { %442 = vmatpush.msrb.mxu2 %v400_v58 }
 0x185   :  { %471 = vmatpush.msrb.mxu3 %v401_v59  ;;  %v668_v57 = vpop.eup %667 }
 0x186   :  { %443 = vmatpush.msrb.mxu2 %v398_v62  ;;  %v546_v62 = vmul.f32 0.6931472, %v668_v57 }
 0x187   :  { %472 = vmatpush.msrb.mxu3 %v399_v63 }
 0x188   :  { %444 = vmatpush.msrb.mxu2 %v396_v0 }
 0x189   :  { %473 = vmatpush.msrb.mxu3 %v397_v1  ;;  %v547_v1 = vmax.f32 %v546_v62, -3.4028235e+38 }
 0x18a   :  { %445 = vmatpush.msrb.mxu2 %v394_v24 }
 0x18b   :  { %474 = vmatpush.msrb.mxu3 %v395_v2  ;;  %638 = vmatmul.msk.f32.vlgmr.msrb.gmra.mxu2 %vm96_vm0, %v32_v3  ;;  %v550_v18 = vperm.slane %v547_v1, 1 }
 0x18c   :  { %642 = vmatmul.msk.f32.vlgmr.msrb.gmra.mxu3 %vm96_vm0, %v32_v3 }
 0x193   :  { %639 = vmatmul.msk.f32.gmra.mxu2 %vm96_vm0, %v33_v5 }
 0x194   :  { %643 = vmatmul.msk.f32.gmra.mxu3 %vm96_vm0, %v33_v5  ;;  %v541_v5 = vpop.permute.xlu2 %540 }
 0x19b   :  { %640 = vmatmul.msk.f32.gmra.mxu2 %vm96_vm0, %v34_v34 }
 0x19c   :  { %644 = vmatmul.msk.f32.gmra.mxu3 %vm96_vm0, %v34_v34 }
 0x1a3   :  { %641 = vmatmul.msk.f32.gmra.mxu2 %vm96_vm0, %v35_v29 }
 0x1a4   :  { %645 = vmatmul.msk.f32.gmra.mxu3 %vm96_vm0, %v35_v29 }
 0x20e   :  { %v447_v7 = vpop.f32.mrf.mxu2 }
 0x20f   :  { %v476_v8 = vpop.f32.mrf.mxu3  ;;  %v448_v16 = vadd.f32 %v447_v7, %v404_v6  ;;  %v549_v7 = vperm.slane %v547_v1, 0 }
 0x210   :  { %v477_v17 = vadd.f32 %v476_v8, %v404_v6  ;;  %v561_v6 = vlaneseq }
 0x211   :  { %v488_v27 = vmax.f32 %v448_v16, 0.0 }
 0x212   :  { %v489_v28 = vmax.f32 %v477_v17, 0.0  ;;  %vm563_vm2 = vcmp.lt.s32.totalorder %v561_v6, 256 }
 0x213   :  { %v512_v38 = vmul.f32 %v498_v32, %v488_v27 }
 0x214   :  { %v513_v39 = vmul.f32 %v498_v32, %v489_v28 }
 0x216   :  { %v450_v11 = vpop.f32.mrf.mxu2 }
 0x217   :  { %v479_v12 = vpop.f32.mrf.mxu3  ;;  %v451_v14 = vadd.f32 %v450_v11, %v408_v9 }
 0x218   :  { %v480_v15 = vadd.f32 %v479_v12, %v408_v9 }
 0x219   :  { %v490_v25 = vmax.f32 %v451_v14, 0.0 }
 0x21a   :  { %v491_v26 = vmax.f32 %v480_v15, 0.0 }
 0x21b   :  { %v514_v35 = vmul.f32 %v502_v23, %v490_v25 }
 0x21c   :  { %v515_v36 = vmul.f32 %v502_v23, %v491_v26 }
 0x21d   :  { %v520_v46 = vadd.f32 %v514_v35, %v512_v38 }
 0x21e   :  { %v453_v19 = vpop.f32.mrf.mxu2  ;;  %v529_v47 = vadd.f32 %v515_v36, %v513_v39 }
 0x21f   :  { %v482_v20 = vpop.f32.mrf.mxu3  ;;  %v454_v21 = vadd.f32 %v453_v19, %v412_v10 }
 0x220   :  { %v483_v22 = vadd.f32 %v482_v20, %v412_v10 }
 0x221   :  { %v492_v30 = vmax.f32 %v454_v21, 0.0 }
 0x222   :  { %v493_v31 = vmax.f32 %v483_v22, 0.0 }
 0x223   :  { %v516_v44 = vmul.f32 %v506_v33, %v492_v30 }
 0x224   :  { %v517_v45 = vmul.f32 %v506_v33, %v493_v31 }
 0x225   :  { %v521_v51 = vadd.f32 %v520_v46, %v516_v44 }
 0x226   :  { %v456_v40 = vpop.f32.mrf.mxu2  ;;  %v530_v52 = vadd.f32 %v529_v47, %v517_v45 }
 0x227   :  { %v485_v41 = vpop.f32.mrf.mxu3  ;;  %v457_v42 = vadd.f32 %v456_v40, %v416_v13 }
 0x228   :  { %v486_v43 = vadd.f32 %v485_v41, %v416_v13 }
 0x229   :  { %v494_v48 = vmax.f32 %v457_v42, 0.0 }
 0x22a   :  { %v495_v49 = vmax.f32 %v486_v43, 0.0 }
 0x22b   :  { %v518_v53 = vmul.f32 %v510_v50, %v494_v48 }
 0x22c   :  { %v519_v54 = vmul.f32 %v510_v50, %v495_v49 }
 0x22d   :  { %v522_v55 = vadd.f32 %v521_v51, %v518_v53 }
 0x22e   :  { %v531_v56 = vadd.f32 %v530_v52, %v519_v54 }
 0x22f   :  { %v523_v58 = vrot.slane %v522_v55, 4 }
 0x230   :  { %v532_v59 = vrot.slane %v531_v56, 4 }
 0x231   :  { %v524_v60 = vadd.f32 %v523_v58, %v522_v55 }
 0x232   :  { %v533_v61 = vadd.f32 %v532_v59, %v531_v56 }
 0x233   :  { %v525_v63 = vrot.slane %v524_v60, 2 }
 0x234   :  { %v534_v0 = vrot.slane %v533_v61, 2 }
 0x235   :  { %v526_v24 = vadd.f32 %v525_v63, %v524_v60 }
 0x236   :  { %v535_v2 = vadd.f32 %v534_v0, %v533_v61 }
 0x237   :  { %v527_v3 = vrot.slane %v526_v24, 1 }
 0x238   :  { %v536_v4 = vrot.slane %v535_v2, 1 }
 0x239   :  { %v528_v34 = vadd.f32 %v527_v3, %v526_v24 }
 0x23a   :  { %v537_v29 = vadd.f32 %v536_v4, %v535_v2 }
 0x23b   :  { %v543_v8 = vadd.f32 %v541_v5, %v528_v34 }
 0x23c   :  { %v544_v9 = vadd.f32 %v541_v5, %v537_v29 }
 0x23d   :  { %v553_v12 = vadd.f32 %v549_v7, %v543_v8 }
 0x23e   :  { %v554_v10 = vadd.f32 %v550_v18, %v544_v9  ;;  %v568_v11 = vrot.slane %v544_v9, 7 }
 0x240   :  { %v557_v13 = vrot.slane %v554_v10, 7  ;;  %v569_v14 = vsel %vm558_vm1, %v543_v8, %v568_v11 }
 0x241   :  { %572 = vst.msk [vmem:[#allocation2 + $0x1] ss:$2 sm:$0x3] %vm563_vm2, %v569_v14 }
 0x242   :  { %v559_v15 = vsel %vm558_vm1, %v553_v12, %v557_v13 }
 0x243   :  { %565 = vst.msk [vmem:[#allocation2] ss:$2 sm:$0x3] %vm563_vm2, %v559_v15 }
 0x244   :  { %583 = dma.vmem_to_hbm [thread:$0]  %s579_s22, 64, %s581_s0, [#allocation3]  }
 0x245   :  { %693 = dma.done.wait [#allocation3], 64  }
 0x246   :  { %694 = vsyncadd [#allocation3], 4294967232 }
 0x247   :  { %588 = vsyncpa [#allocation3], 1 }

</bundles_post_ra>
